<compile_context>
chip_gen: v5e
topology: v5e:2x2
jax: 0.10.0
libtpu: 0.0.40
codegen_flags: <defaults>
</compile_context>

<pallas_src>
import functools
import math
import random

import jax
import jax.numpy as jnp
from jax import lax
from jax.experimental import pallas as pl
from jax.experimental.pallas import tpu as pltpu


# ----------------------------------------------------------------------------
# small helpers
# ----------------------------------------------------------------------------
def _rup(x, m):
    return ((x + m - 1) // m) * m


def _pick_tile(lo_p):
    # lo_p is a multiple of 128; pick the largest tile in {2048,...,128} dividing it.
    for t in (2048, 1024, 512, 256, 128):
        if lo_p % t == 0:
            return t
    return 128


def _vmem_specs(n):
    return [pl.BlockSpec(memory_space=pltpu.MemorySpace.VMEM) for _ in range(n)]


def _window_tiles(xp, tl, halo):
    """(B, C, Lo_p + halo) -> (B, NT, C, TL + halo) overlapped output-tile windows.

    For NT == 1 (all layers at this model scale) this is a free reshape.
    """
    b, c, ltot = xp.shape
    nt = (ltot - halo) // tl
    if nt == 1:
        return xp[:, None]
    tiles = [xp[:, :, j * tl:j * tl + tl + halo] for j in range(nt)]
    return jnp.stack(tiles, axis=1)


def _elu_f32(v):
    # ELU(alpha=1), f32 input.
    return jnp.where(v > 0, v, jnp.expm1(v))


def _elu_bf16(v_bf16):
    return _elu_f32(v_bf16.astype(jnp.float32)).astype(jnp.bfloat16)


def _fuse_weight(w, cout_p, cin_p):
    """(Cout, Cin, K) -> (Cout_p, K*Cin_p) bf16, W2[co, k*Cin_p + ci] = w[co, ci, k]."""
    cout, cin, k = w.shape
    wk = jnp.transpose(w, (2, 0, 1))                              # (K, Cout, Cin)
    wk = jnp.pad(wk, ((0, 0), (0, cout_p - cout), (0, cin_p - cin)))
    return jnp.transpose(wk, (1, 0, 2)).reshape(cout_p, k * cin_p).astype(jnp.bfloat16)


_COMPILER_PARAMS = pltpu.CompilerParams(
    dimension_semantics=("parallel", "parallel"),
    vmem_limit_bytes=32 * 1024 * 1024,   # v7x-safe (64 MiB physical VMEM per TC)
)


# ----------------------------------------------------------------------------
# Fused stride-1 (dilated) conv kernel: ONE MXU matmul over K*Cin_p contraction,
# bias add, optional pre-activation ELU
# ----------------------------------------------------------------------------
def _conv_kernel(x_ref, w_ref, b_ref, o_ref, *, K, d, pre_elu):
    tl = o_ref.shape[-1]
    win = x_ref[...]                                    # (Cin_p, TL + (K-1)*d) bf16
    if pre_elu:
        win = _elu_bf16(win)
    if K == 1:
        operand = win[:, :tl]
    else:
        operand = jnp.concatenate([win[:, k * d:k * d + tl] for k in range(K)],
                                  axis=0)               # (K*Cin_p, TL)
    acc = jnp.dot(w_ref[...], operand, preferred_element_type=jnp.float32)
    acc = acc + b_ref[...]
    o_ref[...] = acc.astype(o_ref.dtype)


def conv1d_core(x, w, b, *, dilation=1, n_out, pre_elu=False,
                out_dtype=jnp.bfloat16):
    """Dense stride-1 conv: x (B,Cin,Lin), w (Cout,Cin,K), b (Cout,) -> (B,Cout,n_out)."""
    B, Cin, Lin = x.shape
    Cout, _, K = w.shape
    Cin_p, Cout_p = _rup(Cin, 8), _rup(Cout, 8)
    Lo_p = _rup(n_out, 128)
    TL = _pick_tile(Lo_p)
    halo = (K - 1) * dilation
    Lin_need = Lo_p + halo

    x = x.astype(jnp.bfloat16)
    if Lin > Lin_need:
        # Safe: valid outputs only read the first n_out + halo <= Lin_need columns.
        x = x[:, :, :Lin_need]
    xp = jnp.pad(x, ((0, 0), (0, Cin_p - Cin), (0, Lin_need - x.shape[-1])))
    x_tiles = _window_tiles(xp, TL, halo)               # (B, NT, Cin_p, TL+halo)
    NT = x_tiles.shape[1]

    w2 = _fuse_weight(w, Cout_p, Cin_p)                 # (Cout_p, K*Cin_p)
    bp = jnp.pad(b.astype(jnp.float32), (0, Cout_p - Cout)).reshape(Cout_p, 1)

    out = pl.pallas_call(
        functools.partial(_conv_kernel, K=K, d=dilation, pre_elu=pre_elu),
        out_shape=jax.ShapeDtypeStruct((B, Cout_p, Lo_p), out_dtype),
        grid=(B, NT),
        in_specs=[
            pl.BlockSpec((None, None, Cin_p, TL + halo),
                         lambda bb, jj: (bb, jj, 0, 0)),
            pl.BlockSpec((Cout_p, K * Cin_p), lambda bb, jj: (0, 0)),
            pl.BlockSpec((Cout_p, 1), lambda bb, jj: (0, 0)),
        ],
        out_specs=pl.BlockSpec((None, Cout_p, TL), lambda bb, jj: (bb, 0, jj)),
        compiler_params=_COMPILER_PARAMS,
    )(x_tiles, w2, bp)
    return out[:, :Cout, :n_out]


# ----------------------------------------------------------------------------
# Fused residual block kernel: ELU -> conv(K,d) -> ELU -> 1x1 conv, + 1x1 shortcut
# (conv1's K taps fused into one MXU matmul; hidden activation never leaves VMEM)
# ----------------------------------------------------------------------------
def _resblock_kernel(x_ref, w1_ref, b1_ref, w2_ref, b2_ref, ws_ref, bs_ref, o_ref,
                     *, K, d, pad_l):
    tl = o_ref.shape[-1]
    win = x_ref[...]                                    # (Cin_p, TL + (K-1)*d) bf16
    xe = _elu_bf16(win)
    if K == 1:
        op1 = xe[:, :tl]
    else:
        op1 = jnp.concatenate([xe[:, k * d:k * d + tl] for k in range(K)], axis=0)
    h = _elu_f32(jnp.dot(w1_ref[...], op1, preferred_element_type=jnp.float32)
                 + b1_ref[...]).astype(jnp.bfloat16)
    out = jnp.dot(w2_ref[...], h, preferred_element_type=jnp.float32) + b2_ref[...]
    xs = win[:, pad_l:pad_l + tl]                       # raw x for the 1x1 shortcut
    out = out + jnp.dot(ws_ref[...], xs, preferred_element_type=jnp.float32) + bs_ref[...]
    o_ref[...] = out.astype(o_ref.dtype)


def resblock(x, p, *, pad_mode="reflect", causal=False):
    w1, b1 = p["conv1"]["w"], p["conv1"]["b"]           # (hidden, dim, K)
    w2, b2 = p["conv2"]["w"], p["conv2"]["b"]           # (dim, hidden, 1)
    ws, bs = p["shortcut"]["w"], p["shortcut"]["b"]     # (dim, dim, 1)
    d = p["conv1"]["dilation"]
    Chid, C, K = w1.shape
    B, _, L = x.shape

    k_eff = (K - 1) * d + 1
    padding_total = k_eff - 1                           # stride 1
    if causal:
        pad_l, pad_r = padding_total, 0
    else:
        pad_r = padding_total // 2
        pad_l = padding_total - pad_r
    mode = "reflect" if pad_mode == "reflect" else "constant"
    xpad = jnp.pad(x.astype(jnp.bfloat16),
                   ((0, 0), (0, 0), (pad_l, pad_r)), mode=mode)

    Cin_p, Chid_p = _rup(C, 8), _rup(Chid, 8)
    Lo_p = _rup(L, 128)
    TL = _pick_tile(Lo_p)
    halo = (K - 1) * d
    Lin_need = Lo_p + halo
    xpad = jnp.pad(xpad, ((0, 0), (0, Cin_p - C), (0, Lin_need - xpad.shape[-1])))
    x_tiles = _window_tiles(xpad, TL, halo)
    NT = x_tiles.shape[1]

    w1k = _fuse_weight(w1, Chid_p, Cin_p)               # (Chid_p, K*Cin_p)
    w2k = _fuse_weight(w2, Cin_p, Chid_p)               # (Cin_p, Chid_p)
    wsk = _fuse_weight(ws, Cin_p, Cin_p)                # (Cin_p, Cin_p)
    b1p = jnp.pad(b1.astype(jnp.float32), (0, Chid_p - Chid)).reshape(Chid_p, 1)
    b2p = jnp.pad(b2.astype(jnp.float32), (0, Cin_p - C)).reshape(Cin_p, 1)
    bsp = jnp.pad(bs.astype(jnp.float32), (0, Cin_p - C)).reshape(Cin_p, 1)

    out = pl.pallas_call(
        functools.partial(_resblock_kernel, K=K, d=d, pad_l=pad_l),
        out_shape=jax.ShapeDtypeStruct((B, Cin_p, Lo_p), jnp.bfloat16),
        grid=(B, NT),
        in_specs=[
            pl.BlockSpec((None, None, Cin_p, TL + halo),
                         lambda bb, jj: (bb, jj, 0, 0)),
            pl.BlockSpec((Chid_p, K * Cin_p), lambda bb, jj: (0, 0)),
            pl.BlockSpec((Chid_p, 1), lambda bb, jj: (0, 0)),
            pl.BlockSpec((Cin_p, Chid_p), lambda bb, jj: (0, 0)),
            pl.BlockSpec((Cin_p, 1), lambda bb, jj: (0, 0)),
            pl.BlockSpec((Cin_p, Cin_p), lambda bb, jj: (0, 0)),
            pl.BlockSpec((Cin_p, 1), lambda bb, jj: (0, 0)),
        ],
        out_specs=pl.BlockSpec((None, Cin_p, TL), lambda bb, jj: (bb, 0, jj)),
        compiler_params=_COMPILER_PARAMS,
    )(x_tiles, w1k, b1p, w2k, b2p, wsk, bsp)
    return out[:, :C, :L]


# ----------------------------------------------------------------------------
# SConv1d / SConvTranspose1d wrappers (padding, phase decomposition, polyphase)
# ----------------------------------------------------------------------------
def _phase_decompose_conv(x, w, s):
    """Fold stride s into channels: strided conv -> dense stride-1 conv."""
    B, C, Lp = x.shape
    Cout, Cin, K = w.shape
    Lq = -(-Lp // s)
    xq = jnp.pad(x, ((0, 0), (0, 0), (0, Lq * s - Lp))).reshape(B, C, Lq, s)
    x2 = jnp.transpose(xq, (0, 1, 3, 2)).reshape(B, C * s, Lq)       # row c*s + r
    Kq = -(-K // s)
    wq = jnp.pad(w, ((0, 0), (0, 0), (0, Kq * s - K))).reshape(Cout, Cin, Kq, s)
    w2 = jnp.transpose(wq, (0, 1, 3, 2)).reshape(Cout, Cin * s, Kq)
    return x2, w2


def sconv1d(x, p, *, pad_mode="reflect", causal=False, pre_elu=False):
    w, b = p["w"], p["b"]
    stride, dilation = p["stride"], p["dilation"]
    _, _, K = w.shape
    L = x.shape[-1]
    k_eff = (K - 1) * dilation + 1
    padding_total = k_eff - stride
    n_frames = (L - k_eff + padding_total) / stride + 1
    ideal_length = (math.ceil(n_frames) - 1) * stride + (k_eff - padding_total)
    extra = int(ideal_length - L)
    if causal:
        pad_l, pad_r = padding_total, extra
    else:
        pr = padding_total // 2
        pad_l = padding_total - pr
        pad_r = pr + extra
    if pad_l > 0 or pad_r > 0:
        mode = "reflect" if pad_mode == "reflect" else "constant"
        x = jnp.pad(x, ((0, 0), (0, 0), (pad_l, pad_r)), mode=mode)
    Lp = x.shape[-1]
    n_out = (Lp - k_eff) // stride + 1
    if stride == 1:
        return conv1d_core(x, w, b, dilation=dilation, n_out=n_out, pre_elu=pre_elu)
    assert dilation == 1, "stride>1 combined with dilation>1 is not used by SEANet"
    x2, w2 = _phase_decompose_conv(x, w, stride)
    return conv1d_core(x2, w2, b, dilation=1, n_out=n_out, pre_elu=pre_elu)


def sconv_tr1d(x, p, *, trim_right_ratio=1.0, causal=False, pre_elu=False):
    """Polyphase ConvTranspose1d (PyTorch weight layout (Cin, Cout, K))."""
    w, b, s = p["w"], p["b"], p["stride"]
    Cin, Cout, K = w.shape
    B, _, L = x.shape
    J = -(-K // s)                                      # taps per output phase
    wp = jnp.pad(w, ((0, 0), (0, 0), (0, J * s - K)))
    w4 = wp.reshape(Cin, Cout, J, s)[:, :, ::-1, :]
    wall = jnp.transpose(w4, (1, 3, 0, 2)).reshape(Cout * s, Cin, J)
    ball = jnp.repeat(b, s)
    xp = jnp.pad(x, ((0, 0), (0, 0), (J - 1, J - 1)))
    Lo_phase = L + J - 1
    y = conv1d_core(xp, wall, ball, dilation=1, n_out=Lo_phase, pre_elu=pre_elu)
    # interleave phases: out[b, co, q*s + r] = y[b, co*s + r, q]
    y = y.reshape(B, Cout, s, Lo_phase)
    y = jnp.transpose(y, (0, 1, 3, 2)).reshape(B, Cout, s * Lo_phase)
    Lf = (L - 1) * s + K
    y = y[:, :, :Lf]
    padding_total = K - s
    if causal:
        pad_r = math.ceil(padding_total * trim_right_ratio)
        pad_l = padding_total - pad_r
    else:
        pad_r = padding_total // 2
        pad_l = padding_total - pad_r
    return y[:, :, pad_l:y.shape[-1] - pad_r]


# ----------------------------------------------------------------------------
# LSTM layer kernel: input projection FUSED into the recurrence kernel.
# gx = x @ Wih + b stays in VMEM; recurrence matmul runs in bf16 (c/accum in f32).
# ----------------------------------------------------------------------------
def _lstm_layer_kernel(x_ref, wih_ref, whh_ref, b_ref, y_ref, gx_scr, h_scr, c_scr,
                       *, T, Bp, Dp):
    # x_ref: (T*Bp, Dp) bf16; wih/whh: (Dp, 4Dp) bf16; b: (1, 4Dp) f32
    gx_scr[...] = (jnp.dot(x_ref[...], wih_ref[...],
                           preferred_element_type=jnp.float32) + b_ref[...])
    h_scr[...] = jnp.zeros_like(h_scr)
    c_scr[...] = jnp.zeros_like(c_scr)

    def step(t, carry):
        base = pl.multiple_of(t * Bp, Bp)
        gates = gx_scr[pl.ds(base, Bp), :] + jnp.dot(
            h_scr[...].astype(jnp.bfloat16), whh_ref[...],
            preferred_element_type=jnp.float32)
        i_g = jax.nn.sigmoid(gates[:, 0 * Dp:1 * Dp])
        f_g = jax.nn.sigmoid(gates[:, 1 * Dp:2 * Dp])
        g_g = jnp.tanh(gates[:, 2 * Dp:3 * Dp])
        o_g = jax.nn.sigmoid(gates[:, 3 * Dp:4 * Dp])
        c_new = f_g * c_scr[...] + i_g * g_g
        h_new = o_g * jnp.tanh(c_new)
        h_scr[...] = h_new
        c_scr[...] = c_new
        y_ref[pl.ds(base, Bp), :] = h_new.astype(y_ref.dtype)
        return carry

    lax.fori_loop(0, T, step, 0, unroll=2)


def lstm_layer(x_flat, lp, *, T, Bp, Dp):
    wih = lp["wih_p"].astype(jnp.bfloat16)              # (Dp, 4Dp)
    whh = lp["whh_p"].astype(jnp.bfloat16)              # (Dp, 4Dp)
    b = lp["b_p"].reshape(1, 4 * Dp).astype(jnp.float32)
    return pl.pallas_call(
        functools.partial(_lstm_layer_kernel, T=T, Bp=Bp, Dp=Dp),
        out_shape=jax.ShapeDtypeStruct((T * Bp, Dp), jnp.bfloat16),
        in_specs=_vmem_specs(4),
        out_specs=pl.BlockSpec(memory_space=pltpu.MemorySpace.VMEM),
        scratch_shapes=[pltpu.VMEM((T * Bp, 4 * Dp), jnp.float32),
                        pltpu.VMEM((Bp, Dp), jnp.float32),
                        pltpu.VMEM((Bp, Dp), jnp.float32)],
        compiler_params=pltpu.CompilerParams(vmem_limit_bytes=32 * 1024 * 1024),
    )(x_flat, wih, whh, b)


def slstm(x, layers):
    """SLSTM: (B, C, T) -> multi-layer LSTM over time + skip connection."""
    B, C, T = x.shape
    Dp = _rup(C, 128)
    Bp = _rup(B, 8)
    xt = jnp.transpose(x, (2, 0, 1))                                 # (T, B, C)
    xt = jnp.pad(xt, ((0, 0), (0, Bp - B), (0, Dp - C))).astype(jnp.bfloat16)
    h = xt.reshape(T * Bp, Dp)
    for lp in layers:
        h = lstm_layer(h, lp, T=T, Bp=Bp, Dp=Dp)                     # (T*Bp, Dp) bf16
    y = h.reshape(T, Bp, Dp)[:, :B, :C]
    y = jnp.transpose(y, (1, 2, 0))                                  # (B, C, T)
    return (y.astype(jnp.float32) + x.astype(jnp.float32)).astype(jnp.bfloat16)


# ----------------------------------------------------------------------------
# Residual vector quantizer: tiled over rows, all stages + loss sums in-kernel.
# Lane-dense (128-wide) quantized output; bf16 onehot select matmul.
# ----------------------------------------------------------------------------
def _rvq_kernel(x_ref, cb_ref, q_ref, loss_ref, *, n_q, n_total):
    i = pl.program_id(0)
    tn, Dp = x_ref.shape
    V = cb_ref.shape[1]

    @pl.when(i == 0)
    def _():
        loss_ref[...] = jnp.zeros_like(loss_ref)

    x = x_ref[...]                                      # (TN, Dp) f32
    row_ids = i * tn + lax.broadcasted_iota(jnp.int32, (tn, 1), 0)
    row_mask = row_ids < n_total
    residual = x
    qsum = jnp.zeros((tn, Dp), jnp.float32)
    commit = jnp.zeros((1, 1), jnp.float32)
    for qi in range(n_q):                               # static unroll, n_q <= 8
        cb = cb_ref[qi]                                 # (V, Dp) f32
        dots = lax.dot_general(residual, cb, (((1,), (1,)), ((), ())),
                               preferred_element_type=jnp.float32)   # (TN, V)
        r2 = jnp.sum(residual * residual, axis=1, keepdims=True)
        c2 = jnp.sum(cb * cb, axis=1)[None, :]
        dist = r2 - 2.0 * dots + c2
        mind = jnp.min(dist, axis=1, keepdims=True)
        iota_v = lax.broadcasted_iota(jnp.int32, dist.shape, 1)
        idx = jnp.min(jnp.where(dist <= mind, iota_v, V), axis=1, keepdims=True)
        onehot = (iota_v == idx).astype(jnp.bfloat16)   # exact 0/1 -> lossless bf16
        qv = jnp.dot(onehot, cb.astype(jnp.bfloat16),
                     preferred_element_type=jnp.float32)             # (TN, Dp)
        qsum = qsum + qv
        residual = residual - qv
        # per-layer commitment MSE == mean of min distances (reuse, no recompute)
        layer_sq = jnp.where(row_mask, jnp.maximum(mind, 0.0), 0.0)
        commit = commit + jnp.sum(jnp.sum(layer_sq, axis=1, keepdims=True),
                                  axis=0, keepdims=True)
    q_ref[...] = qsum
    diff = jnp.where(row_mask, x - qsum, 0.0)
    l1 = jnp.sum(jnp.sum(jnp.abs(diff), axis=1, keepdims=True), axis=0, keepdims=True)
    l2 = jnp.sum(jnp.sum(diff * diff, axis=1, keepdims=True), axis=0, keepdims=True)
    lane = lax.broadcasted_iota(jnp.int32, (1, 128), 1)
    row = (jnp.where(lane == 0, commit, 0.0) +
           jnp.where(lane == 1, l1, 0.0) +
           jnp.where(lane == 2, l2, 0.0))
    loss_ref[...] = loss_ref[...] + row


def residual_vq(x_bdt, codebooks, n_q_used):
    B, D, T = x_bdt.shape
    V = codebooks.shape[1]
    Dp = _rup(D, 128)
    N = B * T
    TN = min(256, _rup(N, 8))
    Np = _rup(N, TN)
    G = Np // TN
    x_flat = jnp.transpose(x_bdt, (0, 2, 1)).reshape(N, D).astype(jnp.float32)
    x_pad = jnp.pad(x_flat, ((0, Np - N), (0, Dp - D)))
    cb = jnp.pad(codebooks[:n_q_used].astype(jnp.float32),
                 ((0, 0), (0, 0), (0, Dp - D)))

    q, losses = pl.pallas_call(
        functools.partial(_rvq_kernel, n_q=n_q_used, n_total=N),
        out_shape=(jax.ShapeDtypeStruct((Np, Dp), jnp.float32),
                   jax.ShapeDtypeStruct((1, 128), jnp.float32)),
        grid=(G,),
        in_specs=[
            pl.BlockSpec((TN, Dp), lambda i: (i, 0)),
            pl.BlockSpec((n_q_used, V, Dp), lambda i: (0, 0, 0)),
        ],
        out_specs=(pl.BlockSpec((TN, Dp), lambda i: (i, 0)),
                   pl.BlockSpec((1, 128), lambda i: (0, 0))),
        compiler_params=pltpu.CompilerParams(
            dimension_semantics=("arbitrary",),
            vmem_limit_bytes=32 * 1024 * 1024),
    )(x_pad, cb)

    quantized = jnp.transpose(q[:N, :D].reshape(B, T, D), (0, 2, 1))
    denom = float(N * D)
    commit_loss = losses[0, 0] / (denom * n_q_used)     # mean over quantizer stages
    quant_loss = (losses[0, 1] + losses[0, 2]) / denom  # L1 + L2, both mean-reduced
    return quantized, commit_loss, quant_loss


# ----------------------------------------------------------------------------
# Deterministic synthetic parameter initialization (no checkpoint)
# ----------------------------------------------------------------------------
class KeyGen:
    def __init__(self, key):
        self.key = key

    def __call__(self):
        self.key, sub = jax.random.split(self.key)
        return sub


def init_conv(kg, cout, cin, k, stride=1, dilation=1):
    bound = 1.0 / math.sqrt(cin * k)
    return {
        "w": jax.random.uniform(kg(), (cout, cin, k), jnp.float32, -bound, bound),
        "b": jax.random.uniform(kg(), (cout,), jnp.float32, -bound, bound),
        "stride": stride, "dilation": dilation,
    }


def init_convtr(kg, cin, cout, k, stride):
    bound = 1.0 / math.sqrt(cout * k)
    return {
        "w": jax.random.uniform(kg(), (cin, cout, k), jnp.float32, -bound, bound),
        "b": jax.random.uniform(kg(), (cout,), jnp.float32, -bound, bound),
        "stride": stride,
    }


def init_lstm(kg, dim, num_layers):
    """LSTM weights zero-padded so each gate block starts on a 128-lane boundary."""
    Dp = _rup(dim, 128)
    bound = 1.0 / math.sqrt(dim)
    layers = []
    for _ in range(num_layers):
        wih = jax.random.uniform(kg(), (dim, 4 * dim), jnp.float32, -bound, bound)
        whh = jax.random.uniform(kg(), (dim, 4 * dim), jnp.float32, -bound, bound)
        b = jax.random.uniform(kg(), (4 * dim,), jnp.float32, -bound, bound)
        wih_p = jnp.zeros((Dp, 4 * Dp), jnp.float32)
        whh_p = jnp.zeros((Dp, 4 * Dp), jnp.float32)
        b_p = jnp.zeros((4 * Dp,), jnp.float32)
        for g in range(4):
            wih_p = wih_p.at[:dim, g * Dp:g * Dp + dim].set(wih[:, g * dim:(g + 1) * dim])
            whh_p = whh_p.at[:dim, g * Dp:g * Dp + dim].set(whh[:, g * dim:(g + 1) * dim])
            b_p = b_p.at[g * Dp:g * Dp + dim].set(b[g * dim:(g + 1) * dim])
        layers.append({"wih_p": wih_p, "whh_p": whh_p, "b_p": b_p, "dim": dim})
    return layers


def init_resblock(kg, dim, kernel_size, dilation, compress):
    hidden = dim // compress
    return {
        "conv1": init_conv(kg, hidden, dim, kernel_size, 1, dilation),
        "conv2": init_conv(kg, dim, hidden, 1, 1, 1),
        "shortcut": init_conv(kg, dim, dim, 1, 1, 1),   # true_skip=False
    }


def init_encoder(kg, cfg):
    layers = []
    nf = cfg["n_filters"]
    mult = 1
    layers.append(("conv", init_conv(kg, mult * nf, cfg["channels"],
                                     cfg["kernel_size"]), False))
    for ratio in reversed(cfg["ratios"]):
        for j in range(cfg["n_residual_layers"]):
            layers.append(("res", init_resblock(kg, mult * nf,
                                                cfg["residual_kernel_size"],
                                                cfg["dilation_base"] ** j,
                                                cfg["compress"]), False))
        # ELU fused as pre-activation into the strided downsampling conv
        layers.append(("conv", init_conv(kg, mult * nf * 2, mult * nf,
                                         ratio * 2, stride=ratio), True))
        mult *= 2
    if cfg["lstm"]:
        layers.append(("lstm", init_lstm(kg, mult * nf, cfg["lstm"]), False))
    layers.append(("conv", init_conv(kg, cfg["dimension"], mult * nf,
                                     cfg["last_kernel_size"]), True))
    return layers


def init_decoder(kg, cfg):
    layers = []
    nf = cfg["n_filters"]
    mult = int(2 ** len(cfg["ratios"]))
    layers.append(("conv", init_conv(kg, mult * nf, cfg["dimension"],
                                     cfg["kernel_size"]), False))
    if cfg["lstm"]:
        layers.append(("lstm", init_lstm(kg, mult * nf, cfg["lstm"]), False))
    for ratio in cfg["ratios"]:
        layers.append(("convtr", init_convtr(kg, mult * nf, mult * nf // 2,
                                             ratio * 2, ratio), True))
        for j in range(cfg["n_residual_layers"]):
            layers.append(("res", init_resblock(kg, mult * nf // 2,
                                                cfg["residual_kernel_size"],
                                                cfg["dilation_base"] ** j,
                                                cfg["compress"]), False))
        mult //= 2
    layers.append(("conv", init_conv(kg, cfg["channels"], nf,
                                     cfg["last_kernel_size"]), True))
    return layers


def apply_seanet(layers, x, cfg):
    x = x.astype(jnp.bfloat16)
    for kind, p, pre_elu in layers:
        if kind == "conv":
            x = sconv1d(x, p, pad_mode=cfg["pad_mode"], causal=cfg["causal"],
                        pre_elu=pre_elu)
        elif kind == "convtr":
            x = sconv_tr1d(x, p, trim_right_ratio=cfg["trim_right_ratio"],
                           causal=cfg["causal"], pre_elu=pre_elu)
        elif kind == "res":
            x = resblock(x, p, pad_mode=cfg["pad_mode"], causal=cfg["causal"])
        elif kind == "lstm":
            x = slstm(x, p)
    return x


# ----------------------------------------------------------------------------
# SoundStreamGenerator (small synthetic config; same architecture family)
# ----------------------------------------------------------------------------
CFG = dict(
    sample_rate=24000,
    dimension=32,            # hidden_dim
    channels=1,
    n_filters=4,
    n_residual_layers=1,
    ratios=[4, 2],
    kernel_size=7,
    residual_kernel_size=7,
    last_kernel_size=7,
    dilation_base=2,
    compress=2,
    lstm=2,
    causal=False,
    pad_mode="reflect",
    trim_right_ratio=1.0,
    n_q=8,
    bins=1024,
    target_bandwidths=[7.5, 15.0],
)


def init_generator(key, cfg):
    kg = KeyGen(key)
    return {
        "encoder": init_encoder(kg, cfg),
        "decoder": init_decoder(kg, cfg),
        # TODO(synk): kmeans codebook init + EMA updates + dead-code expiry are
        # training-time state; codebooks are deterministic random stand-ins.
        "codebooks": jax.random.normal(
            kg(), (cfg["n_q"], cfg["bins"], cfg["dimension"]), jnp.float32),
    }


def soundstream_generator_forward(params, x, cfg, use_dual_decoder=False):
    encoder_out = apply_seanet(params["encoder"], x, cfg)      # (B, D, T) bf16

    frame_rate = math.ceil(cfg["sample_rate"] / math.prod(cfg["ratios"]))
    max_idx = len(cfg["target_bandwidths"]) - 1
    # NOTE: like the PyTorch module, the bandwidth is drawn on the host; under
    # jax.jit this would become a trace-time constant (one compile per bw).
    bw = cfg["target_bandwidths"][random.randint(0, max_idx)]
    bw_per_q = math.log2(cfg["bins"]) * frame_rate
    n_q_used = cfg["n_q"]
    if bw and bw > 0.0:
        n_q_used = int(max(1, math.floor(bw * 1000 / bw_per_q)))
    n_q_used = min(n_q_used, cfg["n_q"])

    # TODO(synk): straight-through estimator (x + stop_grad(q - x)) is omitted;
    # this is a pure forward pass.
    quantized, commit_loss, quantization_loss = residual_vq(
        encoder_out.astype(jnp.float32), params["codebooks"], n_q_used)

    resyn_audio = apply_seanet(
        params["decoder"], quantized.astype(jnp.bfloat16), cfg).astype(jnp.float32)
    resyn_audio_real = (
        apply_seanet(params["decoder"], encoder_out, cfg).astype(jnp.float32)
        if use_dual_decoder else None)
    return resyn_audio, commit_loss, quantization_loss, resyn_audio_real


if __name__ == "__main__":
    random.seed(0)
    key = jax.random.PRNGKey(0)
    pkey, xkey = jax.random.split(key)
    params = init_generator(pkey, CFG)

    # Input audio (B, 1, T)
    x = 0.1 * jax.random.normal(xkey, (2, 1, 64), jnp.float32)

    resyn, commit_loss, quant_loss, resyn_real = soundstream_generator_forward(
        params, x, CFG, use_dual_decoder=False)

    jax.block_until_ready((resyn, commit_loss, quant_loss))
    assert resyn.shape == (2, 1, 64), resyn.shape
    assert commit_loss.shape == () and quant_loss.shape == ()
    assert resyn_real is None
    print("KERNEL_OK")
</pallas_src>

<mosaic_0001>
module attributes {stable_mosaic.version = 11 : i64} {
  func.func @_conv_kernel(%arg0: i32, %arg1: i32, %arg2: memref<1x1x8x134xbf16, #tpu.memory_space<vmem>>, %arg3: memref<8x56xbf16, #tpu.memory_space<vmem>>, %arg4: memref<8x1xf32, #tpu.memory_space<vmem>>, %arg5: memref<1x8x128xbf16, #tpu.memory_space<vmem>>) attributes {dimension_semantics = [#tpu.dimension_semantics<parallel>, #tpu.dimension_semantics<parallel>], iteration_bounds = array<i64: 2, 1>, scalar_prefetch = 0 : i64, scratch_operands = 0 : i64, tpu.core_type = #tpu.core_type<tc>, window_params = [{transform_indices = @transform_0, window_bounds = array<i64: 1, 1, 8, 134>}, {pipeline_mode = #tpu.pipeline_mode<synchronous>, transform_indices = @transform_1, window_bounds = array<i64: 8, 56>}, {pipeline_mode = #tpu.pipeline_mode<synchronous>, transform_indices = @transform_2, window_bounds = array<i64: 8, 1>}, {transform_indices = @transform_3, window_bounds = array<i64: 1, 8, 128>}]} {
    %c0 = arith.constant 0 : index
    %c0_0 = arith.constant 0 : index
    %c0_1 = arith.constant 0 : index
    %c0_2 = arith.constant 0 : index
    %0 = vector.load %arg2[%c0, %c0_0, %c0_1, %c0_2] : memref<1x1x8x134xbf16, #tpu.memory_space<vmem>>, vector<1x1x8x134xbf16>
    %1 = vector.shape_cast %0 : vector<1x1x8x134xbf16> to vector<8x134xbf16>
    %2 = vector.extract_strided_slice %1 {offsets = [0, 0], sizes = [8, 128], strides = [1, 1]} : vector<8x134xbf16> to vector<8x128xbf16>
    %3 = vector.extract_strided_slice %1 {offsets = [0, 1], sizes = [8, 128], strides = [1, 1]} : vector<8x134xbf16> to vector<8x128xbf16>
    %4 = vector.extract_strided_slice %1 {offsets = [0, 2], sizes = [8, 128], strides = [1, 1]} : vector<8x134xbf16> to vector<8x128xbf16>
    %5 = vector.extract_strided_slice %1 {offsets = [0, 3], sizes = [8, 128], strides = [1, 1]} : vector<8x134xbf16> to vector<8x128xbf16>
    %6 = vector.extract_strided_slice %1 {offsets = [0, 4], sizes = [8, 128], strides = [1, 1]} : vector<8x134xbf16> to vector<8x128xbf16>
    %7 = vector.extract_strided_slice %1 {offsets = [0, 5], sizes = [8, 128], strides = [1, 1]} : vector<8x134xbf16> to vector<8x128xbf16>
    %8 = vector.extract_strided_slice %1 {offsets = [0, 6], sizes = [8, 128], strides = [1, 1]} : vector<8x134xbf16> to vector<8x128xbf16>
    %9 = tpu.concatenate %2, %3, %4, %5, %6, %7, %8 in 0 : vector<8x128xbf16>, vector<8x128xbf16>, vector<8x128xbf16>, vector<8x128xbf16>, vector<8x128xbf16>, vector<8x128xbf16>, vector<8x128xbf16> -> vector<56x128xbf16>
    %c0_3 = arith.constant 0 : index
    %c0_4 = arith.constant 0 : index
    %10 = vector.load %arg3[%c0_3, %c0_4] : memref<8x56xbf16, #tpu.memory_space<vmem>>, vector<8x56xbf16>
    %cst = arith.constant dense<0.000000e+00> : vector<8x128xf32>
    %11 = tpu.matmul %10, %9, %cst {dimension_numbers = #tpu.dot_dimension_numbers<[1], [0], [0], [1], [0, 0, 1, 1], [], []>} : vector<8x56xbf16>, vector<56x128xbf16>, vector<8x128xf32> -> vector<8x128xf32>
    %c0_5 = arith.constant 0 : index
    %c0_6 = arith.constant 0 : index
    %12 = vector.load %arg4[%c0_5, %c0_6] : memref<8x1xf32, #tpu.memory_space<vmem>>, vector<8x1xf32>
    %13 = vector.broadcast %12 : vector<8x1xf32> to vector<8x128xf32>
    %14 = arith.addf %11, %13 : vector<8x128xf32>
    %15 = arith.truncf %14 : vector<8x128xf32> to vector<8x128xbf16>
    %c0_7 = arith.constant 0 : index
    %c0_8 = arith.constant 0 : index
    %c0_9 = arith.constant 0 : index
    %16 = vector.load %arg5[%c0_7, %c0_8, %c0_9] : memref<1x8x128xbf16, #tpu.memory_space<vmem>>, vector<1x8x128xbf16>
    %17 = vector.shape_cast %16 : vector<1x8x128xbf16> to vector<8x128xbf16>
    %18 = vector.shape_cast %15 : vector<8x128xbf16> to vector<1x8x128xbf16>
    tpu.vector_store %arg5[%c0_7, %c0_8, %c0_9], %18 {strides = array<i32>} : memref<1x8x128xbf16, #tpu.memory_space<vmem>>, vector<1x8x128xbf16>,
    return
  }
  func.func @transform_0(%arg0: i32, %arg1: i32) -> (i32, i32, i32, i32) {
    %c0_i32 = arith.constant 0 : i32
    %c0_i32_0 = arith.constant 0 : i32
    %c0_i32_1 = arith.constant 0 : i32
    return %arg0, %arg1, %c0_i32, %c0_i32_0 : i32, i32, i32, i32
  }
  func.func @transform_1(%arg0: i32, %arg1: i32) -> (i32, i32) {
    %c0_i32 = arith.constant 0 : i32
    %c0_i32_0 = arith.constant 0 : i32
    %c0_i32_1 = arith.constant 0 : i32
    return %c0_i32, %c0_i32_0 : i32, i32
  }
  func.func @transform_2(%arg0: i32, %arg1: i32) -> (i32, i32) {
    %c0_i32 = arith.constant 0 : i32
    %c0_i32_0 = arith.constant 0 : i32
    %c0_i32_1 = arith.constant 0 : i32
    return %c0_i32, %c0_i32_0 : i32, i32
  }
  func.func @transform_3(%arg0: i32, %arg1: i32) -> (i32, i32, i32) {
    %c0_i32 = arith.constant 0 : i32
    %c0_i32_0 = arith.constant 0 : i32
    return %arg0, %c0_i32, %arg1 : i32, i32, i32
  }
}

</mosaic_0001>

<bundles_post_ra>
// kernel: tpu_custom_call.1
= control target key start
LH: loop header
LB: loop body
LE: loop exit
PB: predicated region body
PF: predicated region fallthrough
CT: control target
= control target key end

     0   :  { %8 = vsyncpa [#allocation3], 0  ;;  %s749_s0 = inlined_call_operand.hbm [shape: bf16[2,1,8,134], index: 0, kind: input, shape index: {}]   ;;  %s750_s1 = inlined_call_operand.vmem [shape: bf16[8,56], index: 1, kind: input, shape index: {}]   ;;  %s751_s2 = inlined_call_operand.vmem [shape: f32[8,1], index: 2, kind: input, shape index: {}]   ;;  %s752_s3 = inlined_call_operand.hbm [shape: bf16[2,8,128], index: 3, kind: output, shape index: {}]  }
   0x1   :  { %10 = vsyncpa [#allocation3 + $0x1], 0 }
   0x2   :  { %11 = vsyncpa [#allocation4], 0 }
   0x3   :  { %13 = vsyncpa [#allocation4 + $0x1], 0  ;;  %s618_s12 = smov 0   ;;  %s620_s13 = smov 0  }
   0x4   :  { %s622_s14 = smov 0   ;;  %s624_s15 = smov 0  }
   0x5   :  { %s626_s16 = smov 0   ;;  %s628_s17 = smov 0  }
   0x6 LB: > { %s391_s18 = sadd.s32 4294967295, %s589_s17   ;;  %s392_s19 = sadd.s32 4294967294, %s589_s17   ;;  %s589_s17 = sphi %s628_s17, %s19_s17   ;;  %s585_s16 = sphi %s626_s16, %s761_s16   ;;  %s581_s15 = sphi %s624_s15, %s760_s15   ;;  %s577_s14 = sphi %s622_s14, %s759_s14   ;;  %s573_s13 = sphi %s620_s13, %s758_s13   ;;  %s569_s12 = sphi %s618_s12, %s757_s12  }
   0x7   : > { %s31_s20 = sadd.s32 1, %s585_s16  ;;  %s40_s21 = sadd.s32 1, %s577_s14 }
   0x8   : > { %p33_p0 = scmp.ge.s32.totalorder %s31_s20, 2  ;;  %p47_p1 = scmp.ne.s32.totalorder %s577_s14, %s573_s13 }
   0x9   : > { %p48_p2 = scmp.eq.s32.totalorder %s589_s17, 0  ;;  %p53_p3 = scmp.ne.s32.totalorder %s573_s13, %s569_s12 }
   0xa   : > { %s763_s20 = smov (%p33_p0, %s31_s20), 0  ;;  %p54_p5 = scmp.eq.s32.totalorder %s391_s18, 0 }
   0xb   : > { %p659_p4 = por %p48_p2, %p47_p1  ;;  %s35_s23 = ssub.s32 %s585_s16, %s763_s20 }
   0xc   : > { %p121_p6 = scmp.eq.s32.totalorder %s391_s18, 1  ;;  %p38_p7 = scmp.eq.s32.totalorder %s35_s23, 0 }
   0xd   : > { %p665_p8 = por %p54_p5, %p53_p3  ;;  %p127_p10 = scmp.eq.s32.totalorder %s392_s19, 1 }
   0xe   : > { %p669_p9 = por %p121_p6, %p47_p1  ;;  %p394_p12 = scmp.ge.s32.totalorder %s589_s17, 2 }
   0xf   : > { %s674_s26 = scalar_select %p38_p7, %s577_s14, %s40_s21  }
  0x10   : > { %p676_p11 = por %p127_p10, %p53_p3  ;;  %p419_p13 = scmp.lt.s32.totalorder %s589_s17, 2 }
  0x11   : > { %s153_s28 = sand.u32 1, %s577_s14   ;;  %s406_s30 = sshll.u32 %s585_s16, 3 }
  0x12   : > { %s395_s29 = sshll.u32 %s153_s28, 3  ;;  %s164_s6 = scalar_lea.hbm %s749_s0, %s406_s30 }
  0x13   : > { %s157_s7 = scalar_lea.vmem [#allocation2], %s395_s29  ;;  %s166_s9 = sshll.u32 %s164_s6, 4  ;;  %s167_s9 = int_to_ptr.hbm [resolvable:$true] %s166_s9 }
  0x14   : > { %s168_s8 = sshll.u32 %s157_s7, 4  ;;  %p412_p0 = pnand %p419_p13, %p659_p4  ;;  %s169_s8 = int_to_ptr.vmem [resolvable:$true] %s168_s8 }
  0x15   : > { %p398_p1 = scmp.ge.s32.totalorder %s589_s17, 1  ;;  %p173_p2 = scmp.lt.s32.totalorder %s589_s17, 3 }
  0x16   : > { %s154_s10 = scalar_lea.sflag [#allocation3], %s153_s28 }
  0x17   : > { %414 = dma.hbm_to_vmem [thread:$0]  (!%p412_p0), %s167_s9, 128, %s169_s8, %s154_s10  }
  0x18   : > { %p174_p3 = pnand %p398_p1, %p173_p2 }
  0x19   : > { %s692_s11 = sand.u32 (!%p174_p3), 1, %s573_s13  }
  0x1a   : > { %177 = sbr.rel (%p174_p3) target bundleno = 319 (0x13f), region = 32  ;;  %s399_s18 = sshll.u32 (!%p174_p3), %s692_s11, 3 }
  0x1b   : > { %s180_s19 = scalar_lea.sflag (!%p174_p3), [#allocation3], %s692_s11  ;;  %s183_s21 = scalar_lea.vmem (!%p174_p3), [#allocation2], %s399_s18 }
  0x1f   : > { %560 = dma.done.wait (%p665_p8), %s180_s19, 128  }
  0x20   : > { %562 = vsyncadd (%p665_p8), %s180_s19, 4294967168  ;;  %v208_v0 = vld [vmem:[%s183_s21] sm:$0xff]  ;;  %s591_s22 = smov 124   ;;  %s592_s23 = smov 122   ;;  %v597_v9 = vmov 0   ;;  %vm248_vm0 = vcmask 998400  }
  0x21   : > { %v210_v1 = vunpack.c.l.b16 %v208_v0  ;;  %v211_v3 = vunpack.c.h.b16 %v208_v0  ;;  %s593_s28 = smov 123   ;;  %s594_s29 = smov 126   ;;  %v264_v8 = vld [vmem:[%s751_s2] sm:$0xff]  ;;  %476 = vset.pattern.permute.xlu0 %v597_v9  ;;  %vm250_vm1 = vcmask 1043456   ;;  %vm236_vm2 = vcmask 1014784  }
  0x22   : > { %s595_s30 = smov 125   ;;  %s596_s24 = smov 127   ;;  %vm242_vm3 = vcmask 1006592   ;;  %vm224_vm4 = vcmask 1031168   ;;  %vm230_vm5 = vcmask 1022976   ;;  %vm218_vm6 = vcmask 1039360  }
  0x23   : > { %v212_v2 = vpack.c.b16 %v210_v1, %v210_v1  ;;  %v213_v4 = vpack.c.b16 %v211_v3, %v211_v3  ;;  %v263_v29 = vld [vmem:[%s750_s1] sm:$0xf]  ;;  %vm270_vm7 = vcmask 457728   ;;  %s400_s8 = sshll.u32 %s692_s11, 2  ;;  %s403_s9 = sshll.u32 %s581_s15, 2 }
  0x24   : > { %s304_s19 = scalar_lea.hbm %s752_s3, %s403_s9  ;;  %s206_s21 = scalar_lea.vmem [#allocation5], %s400_s8 }
  0x25   : > { %232 = vrot.lane.b32.xlu1 %v212_v2, %s591_s22  ;;  %244 = vrot.lane.b32.xlu0 %v212_v2, %s592_s23  ;;  %s527_s4 = scalar_lea.hbm %s752_s3, 8 }
  0x26   : > { %238 = vrot.lane.b32.xlu2 %v212_v2, %s593_s28 }
  0x2d   : > { %234 = vrot.lane.b32.xlu1 %v213_v4, %s591_s22  ;;  %246 = vrot.lane.b32.xlu0 %v213_v4, %s592_s23  ;;  %s306_s22 = sshll.u32 %s206_s21, 4  ;;  %s308_s23 = sshll.u32 %s304_s19, 4  ;;  %s307_s22 = int_to_ptr.vmem [resolvable:$true] %s306_s22  ;;  %s309_s23 = int_to_ptr.hbm [resolvable:$true] %s308_s23 }
  0x2e   : > { %240 = vrot.lane.b32.xlu2 %v213_v4, %s593_s28  ;;  %s293_s28 = scalar_lea.sflag [#allocation4], %s692_s11 }
  0x35   : > { %222 = vrot.lane.b32.xlu1 %v213_v4, %s594_s29  ;;  %220 = vrot.lane.b32.xlu0 %v212_v2, %s594_s29  ;;  %s521_s29 = sshra.s32 %s309_s23, 4  ;;  %s522_s29 = int_to_ptr.hbm [resolvable:$true] %s521_s29 }
  0x36   : > { %226 = vrot.lane.b32.xlu2 %v212_v2, %s595_s30  ;;  %p528_p7 = scmp.lt.s32.totalorder %s522_s29, %s752_s3 }
  0x3d   : > { %228 = vrot.lane.b32.xlu0 %v213_v4, %s595_s30  ;;  %214 = vrot.lane.b32.xlu1 %v212_v2, %s596_s24  ;;  %s523_s30 = scalar_lea.hbm %s522_s29, 4 }
  0x3e   : > { %216 = vrot.lane.b32.xlu2 %v213_v4, %s596_s24  ;;  %p524_p4 = scmp.ne.s32.totalorder %s522_s29, %s523_s30  ;;  %p529_p8 = scmp.lt.s32.totalorder %s527_s4, %s523_s30 }
  0x40   : > { %p525_p5 = pnand %p524_p4, %p669_p9  ;;  %p530_p10 = por %p529_p8, %p528_p7 }
  0x42   : > { %p526_p6 = pneg %p525_p5 }
  0x44   : > { %p531_p13 = pnand %p530_p10, %p526_p6 }
  0x45   : > { %267 = vperm.xlu0 %476, %v264_v8  }
  0x80   : > { %v239_v5 = vpop.permute.xlu2 %238 }
  0x88   : > { %v241_v10 = vpop.permute.xlu2 %240 }
  0x89   : > { %v243_v17 = vsel %vm242_vm3, %v239_v5, %v241_v10 }
  0x90   : > { %v227_v16 = vpop.permute.xlu2 %226 }
  0x97   : > { %v233_v6 = vpop.permute.xlu1 %232  ;;  %v245_v7 = vpop.permute.xlu0 %244 }
  0x98   : > { %v217_v21 = vpop.permute.xlu2 %216 }
  0x9f   : > { %v235_v11 = vpop.permute.xlu1 %234  ;;  %v247_v12 = vpop.permute.xlu0 %246 }
  0xa0   : > { %v249_v13 = vsel %vm248_vm0, %v245_v7, %v247_v12  ;;  %v237_v15 = vsel %vm236_vm2, %v233_v6, %v235_v11 }
  0xa1   : > { %v275_v14 = vsel %vm250_vm1, %v249_v13, 0  ;;  %v261_v18 = vsel %vm250_vm1, %v237_v15, %v243_v17 }
  0xa2   : > { %281 = vmatpush.bf16.msra.mxu0 %v275_v14 }
  0xa6   : > { %282 = vmatpush.bf16.msra.mxu0 %v261_v18 }
  0xa7   : > { %v223_v19 = vpop.permute.xlu1 %222  ;;  %v221_v20 = vpop.permute.xlu0 %220 }
  0xa8   : > { %v225_v24 = vsel %vm224_vm4, %v221_v20, %v223_v19 }
  0xaf   : > { %v229_v22 = vpop.permute.xlu0 %228  ;;  %v215_v23 = vpop.permute.xlu1 %214 }
  0xb0   : > { %v231_v25 = vsel %vm230_vm5, %v227_v16, %v229_v22  ;;  %v219_v26 = vsel %vm218_vm6, %v215_v23, %v217_v21 }
  0xb1   : > { %v257_v27 = vsel %vm250_vm1, %v225_v24, %v231_v25  ;;  %v253_v28 = vsel %vm250_vm1, %v208_v0, %v219_v26 }
  0xb2   : > { %283 = vmatpush.bf16.msra.mxu0 %v257_v27 }
  0xb6   : > { %284 = vmatpush.bf16.msra.mxu0 %v253_v28 }
  0xb7   : > { %v268_v30 = vpop.permute.xlu0 %267 }
  0xb9   : > { %401 = vmatmul.msk.bf16.vlgmr.msra.gmra.mxu0 %vm270_vm7, %v263_v29 }
 0x136   : > { %v286_v31 = vpop.f32.mrf.mxu0 }
 0x137   : > { %v287_v32 = vadd.f32 %v286_v31, %v268_v30 }
 0x139   : > { %v290_v33 = vpack.c.bf16 %v287_v32, %v287_v32 }
 0x13b   : > { %291 = vst [vmem:[%s206_s21] sm:$0xf] %v290_v33 }
 0x13c   : > { %534 = shalt.err (!%p531_p13)
}
 0x13d   : > { %409 = dma.vmem_to_hbm [thread:$0]  (%p669_p9), %s307_s22, 64, %s309_s23, %s293_s28  }
 0x13e   : > { %v288_v34 = vpop.f32.mrf.mxu0 }
 0x13f PF: > { %s320_s11 = sand.u32 1, %s569_s12   ;;  %p416_p0 = pnand %p394_p12, %p676_p11 }
 0x140   : > { %s321_s7 = scalar_lea.sflag [#allocation4], %s320_s11 }
 0x141   : > { %p417_p1 = pneg %p416_p0 }
 0x143   : > { %564 = dma.done.wait (%p417_p1), %s321_s7, 64  }
 0x144   : > { %566 = vsyncadd (%p417_p1), %s321_s7, 4294967232  ;;  %s19_s17 = sadd.s32 1, %s589_s17   ;;  %s757_s12 = smov %s573_s13 }
 0x145   : > { %p16_p2 = scmp.ge.s32.totalorder %s19_s17, 4   ;;  %s758_s13 = smov %s577_s14 }
 0x146   : > { %s759_s14 = smov %s674_s26  ;;  %s760_s15 = smov %s585_s16 }
 0x147   : > { %s761_s16 = smov %s763_s20  ;;  %18 = sbr.rel (!%p16_p2) target bundleno = 6 (0x6), region = 77 }
 0x14c   :  { %327 = vsyncpa [#allocation3], 1 }
 0x14d   :  { %329 = vsyncpa [#allocation3 + $0x1], 1 }
 0x14e   :  { %330 = vsyncpa [#allocation4], 1 }
 0x14f   :  { %332 = vsyncpa [#allocation4 + $0x1], 1 }

</bundles_post_ra>
